<compile_context>
chip_gen: v6e
topology: v6e:2x2x1
jax: 0.10.0
libtpu: 0.0.40
codegen_flags: <defaults>
</compile_context>

<pallas_src>
import functools
import math

import jax
import jax.numpy as jnp
from jax.experimental import pallas as pl
from jax.experimental.pallas import tpu as pltpu


LANE = 128  # vreg lane width; hidden dims are padded to a multiple of this.


def _round_up(x, m):
    return ((x + m - 1) // m) * m


def _activation(pre_f32, bf16_tanh):
    """Bias-add output -> tanh -> bf16 activation for the next MXU matmul."""
    if bf16_tanh:
        # bf16 tanh: faster EUP path on v6e/v7x, output already bf16.
        return jnp.tanh(pre_f32.astype(jnp.bfloat16))
    # f32 tanh (v5e: no bf16 EUP), then cast for the next matmul.
    return jnp.tanh(pre_f32).astype(jnp.bfloat16)


def mlp_policy_kernel(x_ref, w1_ref, b1_ref, w2_ref, b2_ref, w3_ref, b3_ref,
                      mean_ref, *, bf16_tanh):
    # Matmul inputs are bf16 (MXU-native); accumulation and bias adds are f32.
    x = x_ref[...]
    if x.dtype != jnp.bfloat16:   # skip the cast if obs already arrive as bf16
        x = x.astype(jnp.bfloat16)
    h = jnp.dot(x, w1_ref[...], preferred_element_type=jnp.float32)
    h = _activation(h + b1_ref[...], bf16_tanh)
    h = jnp.dot(h, w2_ref[...], preferred_element_type=jnp.float32)
    h = _activation(h + b2_ref[...], bf16_tanh)
    mean_ref[...] = (jnp.dot(h, w3_ref[...], preferred_element_type=jnp.float32)
                     + b3_ref[...])


def init_params(key, ob_dim, ac_dim, n_layers, size):
    """Deterministic PyTorch-Linear-style init (uniform(+-1/sqrt(fan_in)))."""
    assert n_layers == 2, "script is specialized to n_layers=2 hidden layers"
    dims = [(ob_dim, size), (size, size), (size, ac_dim)]
    params = []
    for (fan_in, fan_out) in dims:
        key, kw, kb = jax.random.split(key, 3)
        bound = 1.0 / math.sqrt(fan_in)
        # stored already transposed to (in, out); see layout comment.
        w = jax.random.uniform(kw, (fan_in, fan_out), jnp.float32, -bound, bound)
        b = jax.random.uniform(kb, (1, fan_out), jnp.float32, -bound, bound)
        params.extend([w, b])
    # self.logstd = nn.Parameter(torch.ones(ac_dim))
    logstd = jnp.ones((1, ac_dim), dtype=jnp.float32)
    params.append(logstd)
    return tuple(params)


def pack_params(params, lane=LANE):
    """One-time (outside the hot path) packing of the PyTorch-style params:
    zero-pad hidden dims to a multiple of `lane` (exactly neutral numerically:
    padded units see zero weights and feed zero weights) and cast weights to
    bf16 for the MXU.  Biases and logstd stay f32."""
    w1, b1, w2, b2, w3, b3, logstd = params
    size = w1.shape[1]
    hs = _round_up(size, lane)
    pad = hs - size
    w1p = jnp.pad(w1, ((0, 0), (0, pad))).astype(jnp.bfloat16)
    b1p = jnp.pad(b1, ((0, 0), (0, pad)))
    w2p = jnp.pad(w2, ((0, pad), (0, pad))).astype(jnp.bfloat16)
    b2p = jnp.pad(b2, ((0, 0), (0, pad)))
    w3p = jnp.pad(w3, ((0, pad), (0, 0))).astype(jnp.bfloat16)
    return (w1p, b1p, w2p, b2p, w3p, b3, logstd)   # b3 needs no padding


def _choose_tile_n(n, tile_n, min_tiles=2):
    """Batch tile: multiple of 8 sublanes, capped at tile_n, and — when the
    batch is big enough — small enough to give the grid >= min_tiles steps so
    the "parallel" axis has something to shard across v7x's two TensorCores."""
    tn = min(_round_up(tile_n, 8), _round_up(n, 8))
    if n >= min_tiles * 8:
        tn = min(tn, _round_up(pl.cdiv(n, min_tiles), 8))
    return max(tn, 8)


def mlp_policy_forward(obs, packed_params, *, tile_n=4096, bf16_tanh=True):
    """Returns (mean, std) of the Normal action distribution.
    `std` has shape (1, ac_dim) and broadcasts against `mean` lazily."""
    w1, b1, w2, b2, w3, b3, logstd = packed_params
    n, ob_dim = obs.shape
    hs = w1.shape[1]
    ac_dim = w3.shape[1]

    tn = _choose_tile_n(n, tile_n)
    grid = (pl.cdiv(n, tn),)   # last block may be partial; rows are independent

    kernel = functools.partial(mlp_policy_kernel, bf16_tanh=bf16_tanh)
    mean = pl.pallas_call(
        kernel,
        out_shape=jax.ShapeDtypeStruct((n, ac_dim), jnp.float32),
        grid_spec=pl.GridSpec(
            grid=grid,
            in_specs=[
                pl.BlockSpec((tn, ob_dim), lambda i: (i, 0)),   # obs tile
                pl.BlockSpec((ob_dim, hs), lambda i: (0, 0)),   # W1 (resident)
                pl.BlockSpec((1, hs), lambda i: (0, 0)),        # b1
                pl.BlockSpec((hs, hs), lambda i: (0, 0)),       # W2
                pl.BlockSpec((1, hs), lambda i: (0, 0)),        # b2
                pl.BlockSpec((hs, ac_dim), lambda i: (0, 0)),   # W3
                pl.BlockSpec((1, ac_dim), lambda i: (0, 0)),    # b3
            ],
            out_specs=pl.BlockSpec((tn, ac_dim), lambda i: (i, 0)),
        ),
        compiler_params=pltpu.CompilerParams(
            # shard batch tiles across TCs (v7x); no effect on single-TC chips
            dimension_semantics=("parallel",),
            # room for TN up to ~8K rows on v5e's 16 MiB scoped default while
            # leaving headroom under v7x's 64 MiB physical VMEM
            vmem_limit_bytes=48 * 1024 * 1024,
        ),
    )(obs, w1, b1, w2, b2, w3, b3)

    # Normal(mean, e ** logstd): scale is a function of ac_dim parameters only;
    # compute once here, let the caller broadcast.
    std = jnp.exp(logstd)
    return mean, std


def reference_forward_f32(obs, params):
    w1, b1, w2, b2, w3, b3, logstd = params
    h = jnp.tanh(obs @ w1 + b1)
    h = jnp.tanh(h @ w2 + b2)
    mean = h @ w3 + b3
    return mean, jnp.exp(logstd)


def reference_forward_packed(obs, packed_params, *, bf16_tanh=True):
    """Same mixed-precision semantics as the kernel (tight check)."""
    w1, b1, w2, b2, w3, b3, logstd = packed_params
    h = jnp.dot(obs.astype(jnp.bfloat16), w1, preferred_element_type=jnp.float32)
    h = _activation(h + b1, bf16_tanh)
    h = jnp.dot(h, w2, preferred_element_type=jnp.float32)
    h = _activation(h + b2, bf16_tanh)
    mean = jnp.dot(h, w3, preferred_element_type=jnp.float32) + b3
    return mean, jnp.exp(logstd)


if __name__ == "__main__":
    # Small shapes implied by the module.  batch deliberately not a multiple of
    # the chosen tile (exercises the partial last block) and split across >= 2
    # grid steps (exercises the pipelined / parallel grid).
    batch = 200
    ob_dim = 16
    ac_dim = 4
    n_layers = 2
    size = 32

    key = jax.random.PRNGKey(0)
    key, kobs = jax.random.split(key)
    obs = jax.random.normal(kobs, (batch, ob_dim), dtype=jnp.float32)

    params = init_params(key, ob_dim, ac_dim, n_layers, size)
    packed = pack_params(params)

    mean, std = mlp_policy_forward(obs, packed)
    jax.block_until_ready((mean, std))
    assert mean.shape == (batch, ac_dim)
    assert std.shape == (1, ac_dim)

    # Tight check vs a reference with identical bf16/f32 mixed precision.
    ref_mean_p, ref_std = reference_forward_packed(obs, packed)
    assert jnp.allclose(mean, ref_mean_p, atol=2e-2, rtol=2e-2), float(
        jnp.max(jnp.abs(mean - ref_mean_p)))
    assert jnp.allclose(std, ref_std, atol=1e-6, rtol=1e-6)

    # Looser check vs the pure-f32 PyTorch-equivalent reference (bf16 matmul
    # inputs / bf16 tanh give ~1e-2-level divergence, as expected).
    ref_mean_f32, ref_std_f32 = reference_forward_f32(obs, params)
    assert jnp.allclose(mean, ref_mean_f32, atol=5e-2, rtol=5e-2), float(
        jnp.max(jnp.abs(mean - ref_mean_f32)))
    assert jnp.allclose(std, ref_std_f32, atol=1e-6, rtol=1e-6)

    # TODO(synk): Normal.rsample()/get_action sampling, the discrete
    # (logits_na) branch, Adam optimizer and update() are training/sampling
    # time, not the forward hot path, so they are intentionally not kernelized.
    print("KERNEL_OK")
</pallas_src>

<mosaic_0001>
module attributes {stable_mosaic.version = 11 : i64} {
  func.func @mlp_policy_kernel(%arg0: i32, %arg1: memref<104x16xf32, #tpu.memory_space<vmem>>, %arg2: memref<16x128xbf16, #tpu.memory_space<vmem>>, %arg3: memref<1x128xf32, #tpu.memory_space<vmem>>, %arg4: memref<128x128xbf16, #tpu.memory_space<vmem>>, %arg5: memref<1x128xf32, #tpu.memory_space<vmem>>, %arg6: memref<128x4xbf16, #tpu.memory_space<vmem>>, %arg7: memref<1x4xf32, #tpu.memory_space<vmem>>, %arg8: memref<104x4xf32, #tpu.memory_space<vmem>>) attributes {dimension_semantics = [#tpu.dimension_semantics<parallel>], iteration_bounds = array<i64: 2>, scalar_prefetch = 0 : i64, scratch_operands = 0 : i64, tpu.core_type = #tpu.core_type<tc>, window_params = [{transform_indices = @transform_0, window_bounds = array<i64: 104, 16>}, {pipeline_mode = #tpu.pipeline_mode<synchronous>, transform_indices = @transform_1, window_bounds = array<i64: 16, 128>}, {pipeline_mode = #tpu.pipeline_mode<synchronous>, transform_indices = @transform_2, window_bounds = array<i64: 1, 128>}, {pipeline_mode = #tpu.pipeline_mode<synchronous>, transform_indices = @transform_3, window_bounds = array<i64: 128, 128>}, {pipeline_mode = #tpu.pipeline_mode<synchronous>, transform_indices = @transform_4, window_bounds = array<i64: 1, 128>}, {pipeline_mode = #tpu.pipeline_mode<synchronous>, transform_indices = @transform_5, window_bounds = array<i64: 128, 4>}, {pipeline_mode = #tpu.pipeline_mode<synchronous>, transform_indices = @transform_6, window_bounds = array<i64: 1, 4>}, {transform_indices = @transform_7, window_bounds = array<i64: 104, 4>}]} {
    %c0 = arith.constant 0 : index
    %c0_0 = arith.constant 0 : index
    %0 = vector.load %arg1[%c0, %c0_0] : memref<104x16xf32, #tpu.memory_space<vmem>>, vector<104x16xf32>
    %1 = arith.truncf %0 : vector<104x16xf32> to vector<104x16xbf16>
    %c0_1 = arith.constant 0 : index
    %c0_2 = arith.constant 0 : index
    %2 = vector.load %arg2[%c0_1, %c0_2] : memref<16x128xbf16, #tpu.memory_space<vmem>>, vector<16x128xbf16>
    %cst = arith.constant dense<0.000000e+00> : vector<104x128xf32>
    %3 = tpu.matmul %1, %2, %cst {dimension_numbers = #tpu.dot_dimension_numbers<[1], [0], [0], [1], [0, 0, 1, 1], [], []>} : vector<104x16xbf16>, vector<16x128xbf16>, vector<104x128xf32> -> vector<104x128xf32>
    %c0_3 = arith.constant 0 : index
    %c0_4 = arith.constant 0 : index
    %4 = vector.load %arg3[%c0_3, %c0_4] : memref<1x128xf32, #tpu.memory_space<vmem>>, vector<1x128xf32>
    %5 = vector.broadcast %4 : vector<1x128xf32> to vector<104x128xf32>
    %6 = arith.addf %3, %5 : vector<104x128xf32>
    %7 = arith.truncf %6 : vector<104x128xf32> to vector<104x128xbf16>
    %8 = math.tanh %7 : vector<104x128xbf16>
    %c0_5 = arith.constant 0 : index
    %c0_6 = arith.constant 0 : index
    %9 = vector.load %arg4[%c0_5, %c0_6] : memref<128x128xbf16, #tpu.memory_space<vmem>>, vector<128x128xbf16>
    %cst_7 = arith.constant dense<0.000000e+00> : vector<104x128xf32>
    %10 = tpu.matmul %8, %9, %cst_7 {dimension_numbers = #tpu.dot_dimension_numbers<[1], [0], [0], [1], [0, 0, 1, 1], [], []>} : vector<104x128xbf16>, vector<128x128xbf16>, vector<104x128xf32> -> vector<104x128xf32>
    %c0_8 = arith.constant 0 : index
    %c0_9 = arith.constant 0 : index
    %11 = vector.load %arg5[%c0_8, %c0_9] : memref<1x128xf32, #tpu.memory_space<vmem>>, vector<1x128xf32>
    %12 = vector.broadcast %11 : vector<1x128xf32> to vector<104x128xf32>
    %13 = arith.addf %10, %12 : vector<104x128xf32>
    %14 = arith.truncf %13 : vector<104x128xf32> to vector<104x128xbf16>
    %15 = math.tanh %14 : vector<104x128xbf16>
    %c0_10 = arith.constant 0 : index
    %c0_11 = arith.constant 0 : index
    %16 = vector.load %arg6[%c0_10, %c0_11] : memref<128x4xbf16, #tpu.memory_space<vmem>>, vector<128x4xbf16>
    %cst_12 = arith.constant dense<0.000000e+00> : vector<104x4xf32>
    %17 = tpu.matmul %15, %16, %cst_12 {dimension_numbers = #tpu.dot_dimension_numbers<[1], [0], [0], [1], [0, 0, 1, 1], [], []>} : vector<104x128xbf16>, vector<128x4xbf16>, vector<104x4xf32> -> vector<104x4xf32>
    %c0_13 = arith.constant 0 : index
    %c0_14 = arith.constant 0 : index
    %18 = vector.load %arg7[%c0_13, %c0_14] : memref<1x4xf32, #tpu.memory_space<vmem>>, vector<1x4xf32>
    %19 = vector.broadcast %18 : vector<1x4xf32> to vector<104x4xf32>
    %20 = arith.addf %17, %19 : vector<104x4xf32>
    %c0_15 = arith.constant 0 : index
    %c0_16 = arith.constant 0 : index
    %21 = vector.load %arg8[%c0_15, %c0_16] : memref<104x4xf32, #tpu.memory_space<vmem>>, vector<104x4xf32>
    tpu.vector_store %arg8[%c0_15, %c0_16], %20 {strides = array<i32>} : memref<104x4xf32, #tpu.memory_space<vmem>>, vector<104x4xf32>,
    return
  }
  func.func @transform_0(%arg0: i32) -> (i32, i32) {
    %c0_i32 = arith.constant 0 : i32
    %c0_i32_0 = arith.constant 0 : i32
    return %arg0, %c0_i32 : i32, i32
  }
  func.func @transform_1(%arg0: i32) -> (i32, i32) {
    %c0_i32 = arith.constant 0 : i32
    %c0_i32_0 = arith.constant 0 : i32
    %c0_i32_1 = arith.constant 0 : i32
    return %c0_i32, %c0_i32_0 : i32, i32
  }
  func.func @transform_2(%arg0: i32) -> (i32, i32) {
    %c0_i32 = arith.constant 0 : i32
    %c0_i32_0 = arith.constant 0 : i32
    %c0_i32_1 = arith.constant 0 : i32
    return %c0_i32, %c0_i32_0 : i32, i32
  }
  func.func @transform_3(%arg0: i32) -> (i32, i32) {
    %c0_i32 = arith.constant 0 : i32
    %c0_i32_0 = arith.constant 0 : i32
    %c0_i32_1 = arith.constant 0 : i32
    return %c0_i32, %c0_i32_0 : i32, i32
  }
  func.func @transform_4(%arg0: i32) -> (i32, i32) {
    %c0_i32 = arith.constant 0 : i32
    %c0_i32_0 = arith.constant 0 : i32
    %c0_i32_1 = arith.constant 0 : i32
    return %c0_i32, %c0_i32_0 : i32, i32
  }
  func.func @transform_5(%arg0: i32) -> (i32, i32) {
    %c0_i32 = arith.constant 0 : i32
    %c0_i32_0 = arith.constant 0 : i32
    %c0_i32_1 = arith.constant 0 : i32
    return %c0_i32, %c0_i32_0 : i32, i32
  }
  func.func @transform_6(%arg0: i32) -> (i32, i32) {
    %c0_i32 = arith.constant 0 : i32
    %c0_i32_0 = arith.constant 0 : i32
    %c0_i32_1 = arith.constant 0 : i32
    return %c0_i32, %c0_i32_0 : i32, i32
  }
  func.func @transform_7(%arg0: i32) -> (i32, i32) {
    %c0_i32 = arith.constant 0 : i32
    %c0_i32_0 = arith.constant 0 : i32
    return %arg0, %c0_i32 : i32, i32
  }
}

</mosaic_0001>

<bundles_post_ra>
// kernel: tpu_custom_call.1
= control target key start
LH: loop header
LB: loop body
LE: loop exit
PB: predicated region body
PF: predicated region fallthrough
CT: control target
= control target key end

     0   :  { %s1546_s24 = smov 0   ;;  %s1548_s25 = smov 0   ;;  %s1843_s0 = inlined_call_operand.vmem [shape: f32[200,16], index: 0, kind: input, shape index: {}]   ;;  %s1844_s1 = inlined_call_operand.vmem [shape: bf16[16,128], index: 1, kind: input, shape index: {}]   ;;  %s1845_s2 = inlined_call_operand.vmem [shape: f32[1,128], index: 2, kind: input, shape index: {}]   ;;  %s1846_s3 = inlined_call_operand.vmem [shape: bf16[128,128], index: 3, kind: input, shape index: {}]   ;;  %s1847_s4 = inlined_call_operand.vmem [shape: f32[1,128], index: 4, kind: input, shape index: {}]   ;;  %s1848_s5 = inlined_call_operand.vmem [shape: bf16[128,4], index: 5, kind: input, shape index: {}]   ;;  %s1849_s6 = inlined_call_operand.vmem [shape: f32[1,4], index: 6, kind: input, shape index: {}]   ;;  %s1850_s7 = inlined_call_operand.vmem [shape: f32[200,4], index: 7, kind: output, shape index: {}]  }
   0x1   :  { %s1550_s26 = smov 0  }
   0x2 LB: > { %s1559_s27 = sadd.s32 4294967295, %s1470_s26   ;;  %s1561_s28 = sadd.s32 1, %s1470_s26   ;;  %s1470_s26 = sphi %s1550_s26, %s1857_s26   ;;  %s1466_s25 = sphi %s1548_s25, %s1856_s25   ;;  %s1462_s24 = sphi %s1546_s24, %s1855_s24  }
   0x3   : > { %s173_s29 = ssub.s32 %s1470_s26, %s1561_s28  ;;  %s176_s30 = sadd.s32 1, %s1466_s25 }
   0x4   : > { %p174_p0 = scmp.eq.s32.totalorder %s173_s29, 0  ;;  %p186_p1 = scmp.ne.s32.totalorder %s1466_s25, %s1462_s24 }
   0x5   : > { %p187_p2 = scmp.eq.s32.totalorder %s1559_s27, 1  ;;  %p1075_p3 = scmp.ge.s32.totalorder %s1470_s26, 1 }
   0x6   : > { %s1569_s8 = scalar_select %p174_p0, %s1466_s25, %s176_s30  }
   0x7   : > { %p1571_p4 = por %p187_p2, %p186_p1  ;;  %p246_p5 = scmp.lt.s32.totalorder %s1470_s26, 3 }
   0x9   : > { %p247_p6 = pnand %p1075_p3, %p246_p5 }
   0xa   : > { %s1580_s12 = smul.u32 (!%p247_p6), 13, %s1559_s27  ;;  %s278_s22 = sand.u32 (!%p247_p6), 1, %s1462_s24  }
   0xb   : > { %250 = sbr.rel (%p247_p6) target bundleno = 755 (0x2f3), region = 48 }
   0xc   : > { %p286_p7 = scmp.lt.s32.totalorder (!%p247_p6), %s1580_s12, 24  ;;  %s1275_s23 = smul.u32 (!%p247_p6), 104, %s278_s22 }
   0xe   : > { %s1726_s30 = scalar_lea.vmem (!%p247_p6), [#allocation2], %s1275_s23  }
  0x10   : > { %v1367_v0 = vld [vmem:[%s1844_s1] sm:$0xff]   ;;  %v1504_v1 = vmov 0.0   ;;  %vm1505_vm0 = vmmov 0   ;;  %s287_s13 = scalar_select %p286_p7, %s1580_s12, 24  ;;  %vm336_vm1 = vcmask 130048   ;;  %v1368_v8 = vld [vmem:[%s1846_s3 + $0x38] sm:$0xff]  }
  0x11   : > { %1155 = vmatprep.subr.bf16.mxu0 %v1504_v1  ;;  %1273 = vmatprep.subr.bf16.mxu1 %v1504_v1  ;;  %v1369_v13 = vld [vmem:[%s1846_s3 + $0x30] sm:$0xff]   ;;  %v1370_v24 = vld [vmem:[%s1846_s3 + $0x28] sm:$0xff]   ;;  %v1371_v25 = vld [vmem:[%s1846_s3 + $0x20] sm:$0xff]   ;;  %vm792_vm2 = vcmask 31744   ;;  %s814_s24 = ssub.s32 (%p1571_p4), 25, %s1580_s12  ;;  %s1116_s10 = smul.u32 (%p1571_p4), 104, %s1559_s27 }
  0x12   : > { %1156 = vmatpush3.bf16.msra.mxu0 %v1367_v0  ;;  %1157 = vmatprep.mubr.msk.bf16.mxu0 %vm1505_vm0, %v1504_v1  ;;  %s1076_s14 = sshll.u32 %s287_s13, 3  ;;  %v1372_v26 = vld [vmem:[%s1846_s3 + $0x18] sm:$0xff]   ;;  %v1373_v27 = vld [vmem:[%s1846_s3 + $0x10] sm:$0xff]   ;;  %v1374_v28 = vld [vmem:[%s1846_s3 + $0x8] sm:$0xff]   ;;  %p815_p8 = scmp.lt.s32.totalorder (%p1571_p4), %s814_s24, 13 }
  0x13   : > { %1274 = vmatpush3.bf16.msra.mxu1 %v1367_v0  ;;  %1173 = vmatprep.mubr.msk.bf16.mxu1 %vm1505_vm0, %v1504_v1  ;;  %s1594_s17 = scalar_lea.vmem %s1843_s0, %s1076_s14  ;;  %v1375_v29 = vld [vmem:[%s1846_s3] sm:$0xff]   ;;  %v1376_v30 = vld [vmem:[%s1848_s5 + $0x38] sm:$0xff]   ;;  %v1377_v31 = vld [vmem:[%s1848_s5 + $0x30] sm:$0xff]   ;;  %s1761_s14 = scalar_lea.vmem (%p1571_p4), %s1850_s7, %s1116_s10  }
  0x14   : > { %1185 = vmatprep.subr.bf16.mxu1 %v1504_v1  ;;  %1229 = vmatprep.subr.bf16.mxu0 %v1504_v1  ;;  %v301_v2 = vld [vmem:[%s1594_s17] sm:$0xff]  ;;  %v302_v3 = vld [vmem:[%s1594_s17 + $0x8] sm:$0xff]  ;;  %v303_v6 = vld [vmem:[%s1594_s17 + $0x10] sm:$0xff] }
  0x15   : > { %v314_v4 = vpack.c.bf16 %v302_v3, %v301_v2  ;;  %v309_v5 = vld [vmem:[%s1594_s17 + $0x40] sm:$0xff]  ;;  %v310_v7 = vld [vmem:[%s1594_s17 + $0x48] sm:$0xff]  ;;  %v304_v9 = vld [vmem:[%s1594_s17 + $0x18] sm:$0xff] }
  0x16   : > { %v318_v10 = vpack.c.bf16 %v310_v7, %v309_v5  ;;  %v311_v11 = vld [vmem:[%s1594_s17 + $0x50] sm:$0xff]  ;;  %v312_v12 = vld [vmem:[%s1594_s17 + $0x58] sm:$0xff]  ;;  %v315_v14 = vpack.c.bf16 %v304_v9, %v303_v6  ;;  %v305_v16 = vld [vmem:[%s1594_s17 + $0x20] sm:$0xff] }
  0x17   : > { %1158 = vmatmul.mubr.msk.bf16.vlgmr.msra.gmra.mxu0 %vm336_vm1, %v314_v4  ;;  %v319_v15 = vpack.c.bf16 %v312_v12, %v311_v11  ;;  %v306_v17 = vld [vmem:[%s1594_s17 + $0x28] sm:$0xff]  ;;  %v313_v19 = vld [vmem:[%s1594_s17 + $0x60] sm:$0xff]  ;;  %v307_v21 = vld [vmem:[%s1594_s17 + $0x30] sm:$0xff] }
  0x18   : > { %1161 = vmatprep.mubr.msk.bf16.mxu0 %vm1505_vm0, %v1504_v1  ;;  %1174 = vmatmul.mubr.msk.bf16.vlgmr.msra.gmra.mxu1 %vm336_vm1, %v318_v10  ;;  %v316_v18 = vpack.c.bf16 %v306_v17, %v305_v16  ;;  %v320_v20 = vpack.c.bf16 %v313_v19, %v313_v19  ;;  %v308_v22 = vld [vmem:[%s1594_s17 + $0x38] sm:$0xff]  ;;  %v1077_v33 = vld [vmem:[%s1845_s2] ss:$0 sm:$0xff] }
  0x19   : > { %1177 = vmatprep.mubr.msk.bf16.mxu1 %vm1505_vm0, %v1504_v1  ;;  %1186 = vmatpush3.bf16.msra.mxu1 %v1368_v8  ;;  %v317_v23 = vpack.c.bf16 %v308_v22, %v307_v21 }
  0x1a   : > { %1187 = vmatprep.subr.bf16.mxu1 %v1504_v1  ;;  %1230 = vmatpush3.bf16.msra.mxu0 %v1376_v30  ;;  %v1383_v30 = vld [vmem:[%s1848_s5] sm:$0xff]  }
  0x1b   : > { %1231 = vmatprep.subr.bf16.mxu0 %v1504_v1 }
  0x1d   : > { %1188 = vmatpush3.bf16.msra.mxu1 %v1369_v13 }
  0x1e   : > { %1189 = vmatprep.subr.bf16.mxu1 %v1504_v1  ;;  %1232 = vmatpush3.bf16.msra.mxu0 %v1377_v31 }
  0x1f   : > { %1162 = vmatmul.mubr.msk.bf16.gmra.mxu0 %vm336_vm1, %v315_v14  ;;  %1233 = vmatprep.subr.bf16.mxu0 %v1504_v1 }
  0x20   : > { %1165 = vmatprep.mubr.msk.bf16.mxu0 %vm1505_vm0, %v1504_v1  ;;  %1178 = vmatmul.mubr.msk.bf16.gmra.mxu1 %vm336_vm1, %v319_v15 }
  0x21   : > { %1181 = vmatprep.mubr.msk.bf16.mxu1 %vm1505_vm0, %v1504_v1  ;;  %1190 = vmatpush3.bf16.msra.mxu1 %v1370_v24 }
  0x22   : > { %1191 = vmatprep.subr.bf16.mxu1 %v1504_v1 }
  0x25   : > { %1192 = vmatpush3.bf16.msra.mxu1 %v1371_v25  ;;  %v1378_v25 = vld [vmem:[%s1848_s5 + $0x28] sm:$0xff]  }
  0x26   : > { %1193 = vmatprep.subr.bf16.mxu1 %v1504_v1  ;;  %1234 = vmatpush3.bf16.msra.mxu0 %v1378_v25 }
  0x27   : > { %1166 = vmatmul.mubr.msk.bf16.gmra.mxu0 %vm336_vm1, %v316_v18  ;;  %1235 = vmatprep.subr.bf16.mxu0 %v1504_v1 }
  0x28   : > { %1169 = vmatprep.mubr.msk.bf16.mxu0 %vm1505_vm0, %v1504_v1  ;;  %1182 = vmatmul.mubr.msk.bf16.gmra.mxu1 %vm336_vm1, %v320_v20 }
  0x29   : > { %1201 = vmatprep.mubr.msk.bf16.mxu1 %vm1505_vm0, %v1504_v1  ;;  %1194 = vmatpush3.bf16.msra.mxu1 %v1372_v26  ;;  %v1379_v26 = vld [vmem:[%s1848_s5 + $0x20] sm:$0xff]  }
  0x2a   : > { %1195 = vmatprep.subr.bf16.mxu1 %v1504_v1  ;;  %1236 = vmatpush3.bf16.msra.mxu0 %v1379_v26 }
  0x2b   : > { %1237 = vmatprep.subr.bf16.mxu0 %v1504_v1 }
  0x2d   : > { %1196 = vmatpush3.bf16.msra.mxu1 %v1373_v27  ;;  %v1380_v27 = vld [vmem:[%s1848_s5 + $0x18] sm:$0xff]  }
  0x2e   : > { %1197 = vmatprep.subr.bf16.mxu1 %v1504_v1  ;;  %1238 = vmatpush3.bf16.msra.mxu0 %v1380_v27 }
  0x2f   : > { %1170 = vmatmul.mubr.msk.bf16.gmra.mxu0 %vm336_vm1, %v317_v23  ;;  %1239 = vmatprep.subr.bf16.mxu0 %v1504_v1 }
  0x30   : > { %1245 = vmatprep.mubr.msk.bf16.mxu0 %vm1505_vm0, %v1504_v1 }
  0x31   : > { %1198 = vmatpush3.bf16.msra.mxu1 %v1374_v28  ;;  %v1381_v28 = vld [vmem:[%s1848_s5 + $0x10] sm:$0xff]  }
  0x32   : > { %1199 = vmatprep.subr.bf16.mxu1 %v1504_v1  ;;  %1240 = vmatpush3.bf16.msra.mxu0 %v1381_v28 }
  0x33   : > { %1241 = vmatprep.subr.bf16.mxu0 %v1504_v1 }
  0x35   : > { %1200 = vmatpush3.bf16.msra.mxu1 %v1375_v29  ;;  %v1382_v29 = vld [vmem:[%s1848_s5 + $0x8] sm:$0xff]  }
  0x36   : > { %1242 = vmatpush3.bf16.msra.mxu0 %v1382_v29 }
  0x37   : > { %1243 = vmatprep.subr.bf16.mxu0 %v1504_v1 }
  0x3a   : > { %1244 = vmatpush3.bf16.msra.mxu0 %v1383_v30 }
  0xd7   : > { %v392_v32 = vpop.f32.mrf.mxu0 }
  0xd8   : > { %v424_v35 = vpop.f32.mrf.mxu1  ;;  %v393_v37 = vadd.f32 %v1077_v33, %v392_v32  ;;  %v1086_v32 = vld [vmem:[%s1847_s4] ss:$0 sm:$0xff] }
  0xd9   : > { %v1159_v34 = vpop.f32.mrf.mxu0  ;;  %v425_v12 = vadd.f32 %v1077_v33, %v424_v35 }
  0xda   : > { %v1175_v39 = vpop.f32.mrf.mxu1 }
  0xdb   : > { %v395_v36 = vpop.f32.mrf.mxu0 }
  0xdc   : > { %v396_v38 = vadd.f32 %v1077_v33, %v395_v36  ;;  %v427_v42 = vpop.f32.mrf.mxu1 }
  0xdd   : > { %v1160_v40 = vpop.f32.mrf.mxu0  ;;  %v428_v13 = vadd.f32 %v1077_v33, %v427_v42 }
  0xde   : > { %v446_v41 = vpack.c.bf16 %v396_v38, %v393_v37  ;;  %v1176_v44 = vpop.f32.mrf.mxu1 }
  0xdf   : > { %v400_v43 = vpop.f32.mrf.mxu0  ;;  %v450_v14 = vpack.c.bf16 %v428_v13, %v425_v12 }
  0xe0   : > { %1384 = vtanh.bf16 %v446_v41  ;;  %v432_v46 = vpop.f32.mrf.mxu1  ;;  %v401_v48 = vadd.f32 %v1077_v33, %v400_v43 }
  0xe1   : > { %v1163_v45 = vpop.f32.mrf.mxu0  ;;  %v433_v16 = vadd.f32 %v1077_v33, %v432_v46 }
  0xe2   : > { %v1179_v50 = vpop.f32.mrf.mxu1 }
  0xe3   : > { %v403_v47 = vpop.f32.mrf.mxu0 }
  0xe4   : > { %v404_v49 = vadd.f32 %v1077_v33, %v403_v47  ;;  %v435_v53 = vpop.f32.mrf.mxu1 }
  0xe5   : > { %v1164_v51 = vpop.f32.mrf.mxu0  ;;  %v436_v17 = vadd.f32 %v1077_v33, %v435_v53 }
  0xe6   : > { %v447_v52 = vpack.c.bf16 %v404_v49, %v401_v48  ;;  %v1180_v55 = vpop.f32.mrf.mxu1 }
  0xe7   : > { %v408_v54 = vpop.f32.mrf.mxu0  ;;  %v451_v18 = vpack.c.bf16 %v436_v17, %v433_v16 }
  0xe8   : > { %1386 = vtanh.bf16 %v447_v52  ;;  %v440_v57 = vpop.f32.mrf.mxu1  ;;  %v409_v59 = vadd.f32 %v1077_v33, %v408_v54 }
  0xe9   : > { %v1167_v56 = vpop.f32.mrf.mxu0  ;;  %v441_v20 = vadd.f32 %v1077_v33, %v440_v57 }
  0xea   : > { %v1183_v61 = vpop.f32.mrf.mxu1 }
  0xeb   : > { %v411_v58 = vpop.f32.mrf.mxu0  ;;  %v452_v21 = vpack.c.bf16 %v441_v20, %v441_v20 }
  0xec   : > { %v412_v60 = vadd.f32 %v1077_v33, %v411_v58  ;;  %v443_v2 = vpop.f32.mrf.mxu1 }
  0xed   : > { %v1168_v62 = vpop.f32.mrf.mxu0 }
  0xee   : > { %v1385_v63 = vpop.eup %1384  ;;  %v448_v0 = vpack.c.bf16 %v412_v60, %v409_v59  ;;  %v1184_v4 = vpop.f32.mrf.mxu1 }
  0xef   : > { %v416_v3 = vpop.f32.mrf.mxu0  ;;  %1202 = vmatmul.mubr.bf16.vlgmr.msra.gmra.mxu1 %v1385_v63 }
  0xf0   : > { %1388 = vtanh.bf16 %v448_v0  ;;  %1205 = vmatprep.mubr.msk.bf16.mxu1 %vm1505_vm0, %v1504_v1  ;;  %v417_v7 = vadd.f32 %v1077_v33, %v416_v3 }
  0xf1   : > { %v1171_v5 = vpop.f32.mrf.mxu0 }
  0xf3   : > { %v419_v6 = vpop.f32.mrf.mxu0 }
  0xf4   : > { %v420_v8 = vadd.f32 %v1077_v33, %v419_v6 }
  0xf5   : > { %v1172_v9 = vpop.f32.mrf.mxu0 }
  0xf6   : > { %v1387_v10 = vpop.eup %1386  ;;  %v449_v11 = vpack.c.bf16 %v420_v8, %v417_v7 }
  0xf7   : > { %1206 = vmatmul.mubr.bf16.gmra.mxu1 %v1387_v10 }
  0xf8   : > { %1390 = vtanh.bf16 %v449_v11  ;;  %1209 = vmatprep.mubr.msk.bf16.mxu1 %vm1505_vm0, %v1504_v1 }
  0xf9   : > { %1392 = vtanh.bf16 %v450_v14 }
  0xfa   : > { %1394 = vtanh.bf16 %v451_v18 }
  0xfb   : > { %1396 = vtanh.bf16 %v452_v21 }
  0xfe   : > { %v1389_v15 = vpop.eup %1388 }
  0xff   : > { %1210 = vmatmul.mubr.bf16.gmra.mxu1 %v1389_v15 }
 0x100   : > { %1213 = vmatprep.mubr.msk.bf16.mxu1 %vm1505_vm0, %v1504_v1 }
 0x106   : > { %v1391_v19 = vpop.eup %1390 }
 0x107   : > { %1214 = vmatmul.mubr.bf16.gmra.mxu1 %v1391_v19  ;;  %v1393_v22 = vpop.eup %1392 }
 0x108   : > { %1217 = vmatprep.mubr.msk.bf16.mxu1 %vm1505_vm0, %v1504_v1  ;;  %v1395_v23 = vpop.eup %1394 }
 0x109   : > { %v1397_v24 = vpop.eup %1396 }
 0x10f   : > { %1218 = vmatmul.mubr.bf16.gmra.mxu1 %v1393_v22 }
 0x110   : > { %1221 = vmatprep.mubr.msk.bf16.mxu1 %vm1505_vm0, %v1504_v1 }
 0x117   : > { %1222 = vmatmul.mubr.bf16.gmra.mxu1 %v1395_v23 }
 0x118   : > { %1225 = vmatprep.mubr.msk.bf16.mxu1 %vm1505_vm0, %v1504_v1 }
 0x11f   : > { %1226 = vmatmul.mubr.bf16.gmra.mxu1 %v1397_v24  ;;  %v1095_v24 = vld [vmem:[%s1849_s6] ss:$0 sm:$0xff] }
 0x1af   : > { %v565_v31 = vpop.f32.mrf.mxu1 }
 0x1b0   : > { %v566_v35 = vadd.f32 %v1086_v32, %v565_v31 }
 0x1b1   : > { %v1203_v33 = vpop.f32.mrf.mxu1 }
 0x1b3   : > { %v568_v34 = vpop.f32.mrf.mxu1 }
 0x1b4   : > { %v569_v36 = vadd.f32 %v1086_v32, %v568_v34 }
 0x1b5   : > { %v1204_v37 = vpop.f32.mrf.mxu1 }
 0x1b6   : > { %v619_v38 = vpack.c.bf16 %v569_v36, %v566_v35 }
 0x1b7   : > { %v573_v39 = vpop.f32.mrf.mxu1 }
 0x1b8   : > { %1398 = vtanh.bf16 %v619_v38  ;;  %v574_v42 = vadd.f32 %v1086_v32, %v573_v39 }
 0x1b9   : > { %v1207_v40 = vpop.f32.mrf.mxu1 }
 0x1bb   : > { %v576_v41 = vpop.f32.mrf.mxu1 }
 0x1bc   : > { %v577_v43 = vadd.f32 %v1086_v32, %v576_v41 }
 0x1bd   : > { %v1208_v44 = vpop.f32.mrf.mxu1 }
 0x1be   : > { %v620_v45 = vpack.c.bf16 %v577_v43, %v574_v42 }
 0x1bf   : > { %v581_v46 = vpop.f32.mrf.mxu1 }
 0x1c0   : > { %1400 = vtanh.bf16 %v620_v45  ;;  %v582_v49 = vadd.f32 %v1086_v32, %v581_v46 }
 0x1c1   : > { %v1211_v47 = vpop.f32.mrf.mxu1 }
 0x1c3   : > { %v584_v48 = vpop.f32.mrf.mxu1 }
 0x1c4   : > { %v585_v50 = vadd.f32 %v1086_v32, %v584_v48 }
 0x1c5   : > { %v1212_v51 = vpop.f32.mrf.mxu1 }
 0x1c6   : > { %v1399_v52 = vpop.eup %1398  ;;  %v621_v53 = vpack.c.bf16 %v585_v50, %v582_v49 }
 0x1c7   : > { %v589_v54 = vpop.f32.mrf.mxu1  ;;  %1246 = vmatmul.mubr.bf16.vlgmr.msra.gmra.mxu0 %v1399_v52 }
 0x1c8   : > { %1402 = vtanh.bf16 %v621_v53  ;;  %1249 = vmatprep.mubr.msk.bf16.mxu0 %vm1505_vm0, %v1504_v1  ;;  %v590_v57 = vadd.f32 %v1086_v32, %v589_v54 }
 0x1c9   : > { %v1215_v55 = vpop.f32.mrf.mxu1 }
 0x1cb   : > { %v592_v56 = vpop.f32.mrf.mxu1 }
 0x1cc   : > { %v593_v58 = vadd.f32 %v1086_v32, %v592_v56 }
 0x1cd   : > { %v1216_v59 = vpop.f32.mrf.mxu1 }
 0x1ce   : > { %v1401_v60 = vpop.eup %1400  ;;  %v622_v61 = vpack.c.bf16 %v593_v58, %v590_v57 }
 0x1cf   : > { %v597_v62 = vpop.f32.mrf.mxu1  ;;  %1250 = vmatmul.mubr.bf16.gmra.mxu0 %v1401_v60 }
 0x1d0   : > { %1404 = vtanh.bf16 %v622_v61  ;;  %1253 = vmatprep.mubr.msk.bf16.mxu0 %vm1505_vm0, %v1504_v1  ;;  %v598_v2 = vadd.f32 %v1086_v32, %v597_v62 }
 0x1d1   : > { %v1219_v63 = vpop.f32.mrf.mxu1 }
 0x1d3   : > { %v600_v0 = vpop.f32.mrf.mxu1 }
 0x1d4   : > { %v601_v3 = vadd.f32 %v1086_v32, %v600_v0 }
 0x1d5   : > { %v1220_v4 = vpop.f32.mrf.mxu1 }
 0x1d6   : > { %v1403_v5 = vpop.eup %1402  ;;  %v623_v6 = vpack.c.bf16 %v601_v3, %v598_v2 }
 0x1d7   : > { %v605_v7 = vpop.f32.mrf.mxu1  ;;  %1254 = vmatmul.mubr.bf16.gmra.mxu0 %v1403_v5 }
 0x1d8   : > { %1406 = vtanh.bf16 %v623_v6  ;;  %1257 = vmatprep.mubr.msk.bf16.mxu0 %vm1505_vm0, %v1504_v1  ;;  %v606_v10 = vadd.f32 %v1086_v32, %v605_v7 }
 0x1d9   : > { %v1223_v8 = vpop.f32.mrf.mxu1 }
 0x1db   : > { %v608_v9 = vpop.f32.mrf.mxu1 }
 0x1dc   : > { %v609_v11 = vadd.f32 %v1086_v32, %v608_v9 }
 0x1dd   : > { %v1224_v12 = vpop.f32.mrf.mxu1 }
 0x1de   : > { %v1405_v13 = vpop.eup %1404  ;;  %v624_v14 = vpack.c.bf16 %v609_v11, %v606_v10 }
 0x1df   : > { %v613_v15 = vpop.f32.mrf.mxu1  ;;  %1258 = vmatmul.mubr.bf16.gmra.mxu0 %v1405_v13 }
 0x1e0   : > { %1408 = vtanh.bf16 %v624_v14  ;;  %v614_v16 = vadd.f32 %v1086_v32, %v613_v15  ;;  %1261 = vmatprep.mubr.msk.bf16.mxu0 %vm1505_vm0, %v1504_v1 }
 0x1e1   : > { %v1227_v17 = vpop.f32.mrf.mxu1 }
 0x1e2   : > { %v625_v18 = vpack.c.bf16 %v614_v16, %v614_v16 }
 0x1e3   : > { %v616_v19 = vpop.f32.mrf.mxu1 }
 0x1e4   : > { %1410 = vtanh.bf16 %v625_v18 }
 0x1e5   : > { %v1228_v20 = vpop.f32.mrf.mxu1 }
 0x1e6   : > { %v1407_v21 = vpop.eup %1406 }
 0x1e7   : > { %1262 = vmatmul.mubr.bf16.gmra.mxu0 %v1407_v21 }
 0x1e8   : > { %1265 = vmatprep.mubr.msk.bf16.mxu0 %vm1505_vm0, %v1504_v1 }
 0x1ee   : > { %v1409_v22 = vpop.eup %1408 }
 0x1ef   : > { %1266 = vmatmul.mubr.bf16.gmra.mxu0 %v1409_v22 }
 0x1f0   : > { %1269 = vmatprep.mubr.msk.bf16.mxu0 %vm1505_vm0, %v1504_v1 }
 0x1f2   : > { %v1411_v23 = vpop.eup %1410 }
 0x1f7   : > { %1270 = vmatmul.mubr.bf16.gmra.mxu0 %v1411_v23 }
 0x287   : > { %v738_v25 = vpop.f32.mrf.mxu0 }
 0x288   : > { %v739_v26 = vadd.f32 %v1095_v24, %v738_v25 }
 0x289   : > { %v1247_v27 = vpop.f32.mrf.mxu0 }
 0x28a   : > { %793 = vst.msk [vmem:[%s1726_s30] sm:$0xff] %vm792_vm2, %v739_v26 }
 0x28b   : > { %v741_v1 = vpop.f32.mrf.mxu0 }
 0x28c   : > { %v742_v28 = vadd.f32 %v1095_v24, %v741_v1 }
 0x28d   : > { %v1248_v29 = vpop.f32.mrf.mxu0 }
 0x28e   : > { %794 = vst.msk [vmem:[%s1726_s30 + $0x8] sm:$0xff] %vm792_vm2, %v742_v28 }
 0x28f   : > { %v746_v30 = vpop.f32.mrf.mxu0 }
 0x290   : > { %v747_v31 = vadd.f32 %v1095_v24, %v746_v30 }
 0x291   : > { %v1251_v32 = vpop.f32.mrf.mxu0 }
 0x292   : > { %795 = vst.msk [vmem:[%s1726_s30 + $0x10] sm:$0xff] %vm792_vm2, %v747_v31 }
 0x293   : > { %v749_v33 = vpop.f32.mrf.mxu0 }
 0x294   : > { %v750_v34 = vadd.f32 %v1095_v24, %v749_v33 }
 0x295   : > { %v1252_v35 = vpop.f32.mrf.mxu0 }
 0x296   : > { %796 = vst.msk [vmem:[%s1726_s30 + $0x18] sm:$0xff] %vm792_vm2, %v750_v34 }
 0x297   : > { %v754_v36 = vpop.f32.mrf.mxu0 }
 0x298   : > { %v755_v37 = vadd.f32 %v1095_v24, %v754_v36 }
 0x299   : > { %v1255_v38 = vpop.f32.mrf.mxu0 }
 0x29a   : > { %797 = vst.msk [vmem:[%s1726_s30 + $0x20] sm:$0xff] %vm792_vm2, %v755_v37 }
 0x29b   : > { %v757_v39 = vpop.f32.mrf.mxu0 }
 0x29c   : > { %v758_v40 = vadd.f32 %v1095_v24, %v757_v39 }
 0x29d   : > { %v1256_v41 = vpop.f32.mrf.mxu0 }
 0x29e   : > { %798 = vst.msk [vmem:[%s1726_s30 + $0x28] sm:$0xff] %vm792_vm2, %v758_v40 }
 0x29f   : > { %v762_v42 = vpop.f32.mrf.mxu0 }
 0x2a0   : > { %v763_v43 = vadd.f32 %v1095_v24, %v762_v42 }
 0x2a1   : > { %v1259_v44 = vpop.f32.mrf.mxu0 }
 0x2a2   : > { %799 = vst.msk [vmem:[%s1726_s30 + $0x30] sm:$0xff] %vm792_vm2, %v763_v43 }
 0x2a3   : > { %v765_v45 = vpop.f32.mrf.mxu0 }
 0x2a4   : > { %v766_v46 = vadd.f32 %v1095_v24, %v765_v45 }
 0x2a5   : > { %v1260_v47 = vpop.f32.mrf.mxu0 }
 0x2a6   : > { %800 = vst.msk [vmem:[%s1726_s30 + $0x38] sm:$0xff] %vm792_vm2, %v766_v46 }
 0x2a7   : > { %v770_v48 = vpop.f32.mrf.mxu0 }
 0x2a8   : > { %v771_v49 = vadd.f32 %v1095_v24, %v770_v48 }
 0x2a9   : > { %v1263_v50 = vpop.f32.mrf.mxu0 }
 0x2aa   : > { %801 = vst.msk [vmem:[%s1726_s30 + $0x40] sm:$0xff] %vm792_vm2, %v771_v49 }
 0x2ab   : > { %v773_v51 = vpop.f32.mrf.mxu0 }
 0x2ac   : > { %v774_v52 = vadd.f32 %v1095_v24, %v773_v51 }
 0x2ad   : > { %v1264_v53 = vpop.f32.mrf.mxu0 }
 0x2ae   : > { %802 = vst.msk [vmem:[%s1726_s30 + $0x48] sm:$0xff] %vm792_vm2, %v774_v52 }
 0x2af   : > { %v778_v54 = vpop.f32.mrf.mxu0 }
 0x2b0   : > { %v779_v55 = vadd.f32 %v1095_v24, %v778_v54 }
 0x2b1   : > { %v1267_v56 = vpop.f32.mrf.mxu0 }
 0x2b2   : > { %803 = vst.msk [vmem:[%s1726_s30 + $0x50] sm:$0xff] %vm792_vm2, %v779_v55 }
 0x2b3   : > { %v781_v57 = vpop.f32.mrf.mxu0 }
 0x2b4   : > { %v782_v58 = vadd.f32 %v1095_v24, %v781_v57 }
 0x2b5   : > { %v1268_v59 = vpop.f32.mrf.mxu0 }
 0x2b6   : > { %804 = vst.msk [vmem:[%s1726_s30 + $0x58] sm:$0xff] %vm792_vm2, %v782_v58 }
 0x2b7   : > { %v786_v60 = vpop.f32.mrf.mxu0 }
 0x2b8   : > { %v787_v61 = vadd.f32 %v1095_v24, %v786_v60 }
 0x2b9   : > { %v1271_v62 = vpop.f32.mrf.mxu0  ;;  %812 = sbr.rel (!%p1571_p4) target bundleno = 755 (0x2f3), region = 52 }
 0x2ba   : > { %805 = vst.msk [vmem:[%s1726_s30 + $0x60] sm:$0xff] %vm792_vm2, %v787_v61 }
 0x2bb   : > { %v789_v63 = vpop.f32.mrf.mxu0 }
 0x2bd   : > { %v1272_v0 = vpop.f32.mrf.mxu0 }
 0x2be   : > { %s1859_s24 = smov (!%p815_p8, %s814_s24), 13 }
 0x2bf   : > { %s1104_s15 = sshll.u32 %s1859_s24, 7 }
 0x2c0   : > { %p1107_p9 = scmp.eq.s32.totalorder %s1104_s15, 0 }
 0x2c1   : > { %1412 = sdivrem.u32 (!%p1107_p9), %s1859_s24, 13 }
 0x2c2   : > { %823 = sbr.rel (%p1107_p9) target bundleno = 755 (0x2f3), region = 56 }
 0x2ca   : > { %s1767_s9 = spop.drf %1412 }
 0x2cb   : > { %p1108_p10 = scmp.le.s32.totalorder %s1767_s9, 0 }
 0x2cc   : > { %s1852_s27 = smov (!%p1108_p10), %s1761_s14  ;;  %s1853_s12 = smov (!%p1108_p10), %s1726_s30 }
 0x2cd   : > { %1028 = sbr.rel (%p1108_p10) target bundleno = 730 (0x2da), region = 132  ;;  %s1776_s16 = smov (!%p1108_p10), 0  }
 0x2ce   : > { %s1778_s17 = smov (!%p1108_p10), 0  }
 0x2d2 LB: >> { %v912_v2 = vld [vmem:[%s1478_s12] sm:$0xff]  ;;  %v914_v3 = vld [vmem:[%s1478_s12 + $0x8] sm:$0xff]  ;;  %v916_v4 = vld [vmem:[%s1478_s12 + $0x10] sm:$0xff]  ;;  %s938_s18 = sadd.s32 1, %s1482_s16  ;;  %s906_s17 = sadd.s32 1, %s1486_s17   ;;  %s1486_s17 = sphi %s1778_s17, %s906_s17   ;;  %s1482_s16 = sphi %s1776_s16, %s1854_s16   ;;  %s1478_s12 = sphi %s1853_s12, %s943_s12   ;;  %s1474_s27 = sphi %s1852_s27, %s944_s27  }
 0x2d3   : >> { %913 = vst [vmem:[%s1474_s27] sm:$0xff] %v912_v2  ;;  %915 = vst [vmem:[%s1474_s27 + $0x8] sm:$0xff] %v914_v3  ;;  %v918_v5 = vld [vmem:[%s1478_s12 + $0x18] sm:$0xff]  ;;  %v920_v6 = vld [vmem:[%s1478_s12 + $0x20] sm:$0xff]  ;;  %p939_p11 = scmp.ge.s32.totalorder %s938_s18, %s1767_s9  ;;  %p905_p12 = scmp.ge.s32.totalorder %s906_s17, %s1767_s9 }
 0x2d4   : >> { %917 = vst [vmem:[%s1474_s27 + $0x10] sm:$0xff] %v916_v4  ;;  %v922_v7 = vld [vmem:[%s1478_s12 + $0x28] sm:$0xff]  ;;  %919 = vst [vmem:[%s1474_s27 + $0x18] sm:$0xff] %v918_v5  ;;  %v924_v8 = vld [vmem:[%s1478_s12 + $0x30] sm:$0xff] }
 0x2d5   : >> { %921 = vst [vmem:[%s1474_s27 + $0x20] sm:$0xff] %v920_v6  ;;  %923 = vst [vmem:[%s1474_s27 + $0x28] sm:$0xff] %v922_v7  ;;  %v926_v9 = vld [vmem:[%s1478_s12 + $0x38] sm:$0xff]  ;;  %v928_v10 = vld [vmem:[%s1478_s12 + $0x40] sm:$0xff]  ;;  %s1861_s18 = smov (%p939_p11, %s938_s18), 0  ;;  %908 = sbr.rel (!%p905_p12) target bundleno = 722 (0x2d2), region = 138 }
 0x2d6   : >> { %925 = vst [vmem:[%s1474_s27 + $0x30] sm:$0xff] %v924_v8  ;;  %927 = vst [vmem:[%s1474_s27 + $0x38] sm:$0xff] %v926_v9  ;;  %v930_v11 = vld [vmem:[%s1478_s12 + $0x48] sm:$0xff]  ;;  %v932_v12 = vld [vmem:[%s1478_s12 + $0x50] sm:$0xff]  ;;  %s941_s19 = smul.u32 104, %s1861_s18  ;;  %s1854_s16 = smov %s1861_s18 }
 0x2d7   : >> { %929 = vst [vmem:[%s1474_s27 + $0x40] sm:$0xff] %v928_v10  ;;  %v934_v13 = vld [vmem:[%s1478_s12 + $0x58] sm:$0xff]  ;;  %931 = vst [vmem:[%s1474_s27 + $0x48] sm:$0xff] %v930_v11  ;;  %v936_v14 = vld [vmem:[%s1478_s12 + $0x60] sm:$0xff] }
 0x2d8   : >> { %933 = vst [vmem:[%s1474_s27 + $0x50] sm:$0xff] %v932_v12  ;;  %935 = vst [vmem:[%s1474_s27 + $0x58] sm:$0xff] %v934_v13  ;;  %s943_s12 = scalar_lea.vmem %s1726_s30, %s941_s19 [#allocation2]  }
 0x2d9   : >> { %937 = vst [vmem:[%s1474_s27 + $0x60] sm:$0xff] %v936_v14  ;;  %s944_s27 = scalar_lea.vmem %s1761_s14, %s941_s19  }
 0x2da PF: > { %1414 = sdivrem.u32 %s1859_s24, 13 }
 0x2db   : > { %s1109_s20 = smul.u32 104, %s1767_s9 }
 0x2dd   : > { %s949_s21 = scalar_lea.vmem %s1726_s30, %s1109_s20 [#allocation2]   ;;  %s951_s22 = scalar_lea.vmem %s1761_s14, %s1109_s20  }
 0x2e3   : > { %s1415_s23 = spop.drf %1414 }
 0x2e4   : > { %p1111_p13 = scmp.le.s32.totalorder %s1415_s23, 0 }
 0x2e5   : > { %s1488_s26 = smov (!%p1111_p13), %s951_s22   ;;  %s1492_s29 = smov (!%p1111_p13), %s949_s21  }
 0x2e6   : > { %1042 = sbr.rel (%p1111_p13) target bundleno = 755 (0x2f3), region = 143  ;;  %s1496_s10 = smov (!%p1111_p13), 0  }
 0x2e7   : > { %s1500_s11 = smov (!%p1111_p13), 0  }
 0x2eb LB: >> { %v961_v15 = vld [vmem:[%s1494_s29] sm:$0xff]  ;;  %s963_s13 = sadd.s32 1, %s1498_s10  ;;  %s955_s11 = sadd.s32 1, %s1502_s11   ;;  %s1502_s11 = sphi %s1500_s11, %s955_s11   ;;  %s1498_s10 = sphi %s1496_s10, %s1497_s10   ;;  %s1494_s29 = sphi %s1492_s29, %s968_s29   ;;  %s1490_s26 = sphi %s1488_s26, %s969_s26  }
 0x2ec   : >> { %962 = vst [vmem:[%s1490_s26] sm:$0xff] %v961_v15  ;;  %p964_p0 = scmp.ge.s32.totalorder %s963_s13, %s1415_s23  ;;  %p954_p1 = scmp.ge.s32.totalorder %s955_s11, %s1415_s23 }
 0x2ee   : >> { %s1863_s13 = smov (%p964_p0, %s963_s13), 0  ;;  %957 = sbr.rel (!%p954_p1) target bundleno = 747 (0x2eb), region = 149 }
 0x2ef   : >> { %s1112_s30 = sshll.u32 %s1863_s13, 3  ;;  %s1497_s10 = smov %s1863_s13  }
 0x2f0   : >> { %s968_s29 = scalar_lea.vmem %s949_s21, %s1112_s30 [#allocation2]   ;;  %s969_s26 = scalar_lea.vmem %s951_s22, %s1112_s30  }
 0x2f3 PF: > { %p14_p2 = scmp.ge.s32.totalorder %s1561_s28, 4   ;;  %s1855_s24 = smov %s1466_s25 }
 0x2f4   : > { %s1856_s25 = smov %s1569_s8  ;;  %s1857_s26 = smov %s1561_s28 }
 0x2f5   :  { %16 = sbr.rel (!%p14_p2) target bundleno = 2 (0x2), region = 160 }

</bundles_post_ra>
